<compile_context>
chip_gen: v7x
topology: tpu7x:2x2x1
jax: 0.10.0
libtpu: 0.0.40
codegen_flags: <defaults>
</compile_context>

<pallas_src>
import jax
import jax.numpy as jnp
from jax.experimental import pallas as pl
from jax.experimental.pallas import tpu as pltpu


# --------------------------------------------------------------------------
# Hardware detection (generation-aware VMEM cap + bf16-EUP availability).
# --------------------------------------------------------------------------
def _tpu_hw_info():
    kind = ""
    try:
        kind = jax.devices()[0].device_kind.lower()
    except Exception:
        pass

    vmem_cap = None
    try:
        info = pltpu.get_tpu_info()
        vmem_cap = int(getattr(info, "vmem_capacity_bytes", 0) or 0) or None
    except Exception:
        vmem_cap = None
    if vmem_cap is None:
        if "7" in kind:                                   # v7x: 64 MiB per TC
            vmem_cap = 64 << 20
        elif any(t in kind for t in ("v4", "v5", "v6")):  # 128 MiB
            vmem_cap = 128 << 20
        else:
            vmem_cap = 64 << 20                           # conservative default

    # bf16 EUP/VPU exists on v6e and later; keep f32 transcendentals on <= v5.
    bf16_eup = not any(t in kind for t in ("v2", "v3", "v4", "v5"))
    return vmem_cap, bf16_eup


# --------------------------------------------------------------------------
# Kernel
# --------------------------------------------------------------------------
def _make_kernel(C, T, tt, needs_mask, tanh_bf16):
    def kernel(x_ref, w1_ref, b1_ref, w2_ref, b2_ref, out_ref, acc_sc):
        # x_ref:  (1, C, tt) f32      w1_ref: (A, C) bf16   b1_ref: (A, 1) f32
        # w2_ref: (C, A) bf16         b2_ref: (C, 1) f32
        # out_ref: (1, 2C, 1) f32 (resident across the time grid axis)
        # acc_sc: (C, 4) f32 columns [m, l, s1, s2] (folded accumulators)
        t_idx = pl.program_id(1)

        @pl.when(t_idx == 0)
        def _():
            acc_sc[...] = jnp.zeros_like(acc_sc)
            acc_sc[:, 0:1] = jnp.full((C, 1), -jnp.inf, dtype=jnp.float32)

        x = x_ref[0]                                         # (C, tt) f32
        if needs_mask:
            lane = jax.lax.broadcasted_iota(jnp.int32, (C, tt), 1)
            valid = (t_idx * tt + lane) < T
            x = jnp.where(valid, x, 0.0)

        # attention logits e = W2 @ tanh(W1 @ x + b1) + b2 -> (C, tt), f32 acc
        pre = jnp.dot(w1_ref[...], x.astype(jnp.bfloat16),
                      preferred_element_type=jnp.float32) + b1_ref[...]
        if tanh_bf16:
            # bf16 EUP path (v6e/v7x): h is consumed as bf16 by the next matmul.
            h = jnp.tanh(pre.astype(jnp.bfloat16))
        else:
            # v5e and older: no bf16 EUP; tanh in f32, cast for the MXU.
            h = jnp.tanh(pre).astype(jnp.bfloat16)
        e = jnp.dot(w2_ref[...], h,
                    preferred_element_type=jnp.float32) + b2_ref[...]
        if needs_mask:
            e = jnp.where(valid, e, -jnp.inf)

        # Online-softmax statistics over the time (lane) axis.  Note a tile is
        # never fully masked (num_t = cdiv(T, tt)), so m_new stays finite.
        m_old = acc_sc[:, 0:1]
        l_old = acc_sc[:, 1:2]
        s1_old = acc_sc[:, 2:3]
        s2_old = acc_sc[:, 3:4]

        m_new = jnp.maximum(m_old, jnp.max(e, axis=1, keepdims=True))
        scale = jnp.exp(m_old - m_new)                       # (C, 1)
        p = jnp.exp(e - m_new)                               # (C, tt) f32; masked -> 0
        px = p * x
        acc_sc[:, 0:1] = m_new
        acc_sc[:, 1:2] = scale * l_old + jnp.sum(p, axis=1, keepdims=True)
        acc_sc[:, 2:3] = scale * s1_old + jnp.sum(px, axis=1, keepdims=True)
        acc_sc[:, 3:4] = scale * s2_old + jnp.sum(px * x, axis=1, keepdims=True)

        @pl.when(t_idx == pl.num_programs(1) - 1)
        def _():
            inv_l = pl.reciprocal(acc_sc[:, 1:2], approx=False)   # (C, 1)
            mean = acc_sc[:, 2:3] * inv_l
            msq = acc_sc[:, 3:4] * inv_l
            std = jnp.sqrt(jnp.maximum(msq - mean * mean, 1e-9))
            out_ref[0, 0:C, :] = mean.astype(out_ref.dtype)
            out_ref[0, C:2 * C, :] = std.astype(out_ref.dtype)

    return kernel


# --------------------------------------------------------------------------
# Wrapper
# --------------------------------------------------------------------------
def attentive_stats_pool(x_nct, w1, b1, w2, b2, *,
                         max_time_tile=8192, tanh_bf16=None):
    """x_nct: (B, C, T) float32, exactly as the PyTorch module expects.

    w1: (A, C) conv1d weight (kernel dim squeezed), b1: (A,)
    w2: (C, A) conv1d weight (kernel dim squeezed), b2: (C,)
    Returns (B, 2*C) float32 = cat([mean, std], dim=1).

    Note: attention logits use bf16 MXU operands (and bf16 tanh on v6e/v7x);
    this intentionally deviates slightly from the pure-f32 PyTorch path.
    """
    x_nct = jnp.asarray(x_nct, jnp.float32)
    B, C, T = x_nct.shape
    A = w1.shape[0]
    assert w1.shape == (A, C) and w2.shape == (C, A)
    assert max_time_tile % 128 == 0, "time tile cap must be lane-aligned"

    vmem_cap, bf16_eup = _tpu_hw_info()
    if tanh_bf16 is None:
        tanh_bf16 = bf16_eup

    # bf16 MXU operands; biases stay f32 (added to the f32 matmul results).
    w1_bf = jnp.asarray(w1, jnp.bfloat16)                    # (A, C)
    w2_bf = jnp.asarray(w2, jnp.bfloat16)                    # (C, A)
    b1_2d = jnp.asarray(b1, jnp.float32).reshape(A, 1)
    b2_2d = jnp.asarray(b2, jnp.float32).reshape(C, 1)

    # ---- generation-aware VMEM budget and time-tile derivation ------------
    def pad8(n):
        return -(-n // 8) * 8

    vmem_limit = int(0.62 * vmem_cap)        # ~40 MiB on v7x, ~79 MiB on v5e/v6e

    fixed_bytes = (
        2 * (2 * A * C * 2)                          # two bf16 weights, 2 bufs each
        + 2 * 4 * 128 * (pad8(A) + pad8(C))          # lane-padded biases, 2 bufs
        + 2 * 4 * 128 * pad8(2 * C)                  # (1, 2C, 1) output block, 2 bufs
        + 4 * 128 * pad8(C)                          # folded (C, 4) accumulator scratch
        + (2 << 20)                                  # compiler-internal headroom
    )

    def bytes_per_col(n_xbuf):
        # n_xbuf f32 x buffers + bf16 x copy + mask + (A,tt) pre-tanh/h
        # + e / p / px / px*x f32 intermediates.
        return (4 * n_xbuf + 23) * C + 6 * A

    def pick_tile(n_xbuf):
        budget = max(0, vmem_limit - fixed_bytes)
        cols = max(128, (budget // bytes_per_col(n_xbuf) // 128) * 128)
        tile_cap = min(max_time_tile, cols)
        if T <= tile_cap:
            return T, 1, False
        return tile_cap, pl.cdiv(T, tile_cap), (T % tile_cap) != 0

    tt, num_t, needs_mask = pick_tile(3)
    want_bufs = 3 if num_t >= 3 else 2        # deepen x pipeline only when useful
    if want_bufs == 2:
        tt, num_t, needs_mask = pick_tile(2)

    est = fixed_bytes + bytes_per_col(want_bufs) * tt
    vmem_limit_final = int(min(int(0.9 * vmem_cap), max(vmem_limit, est)))

    def run(n_xbuf):
        kernel = _make_kernel(C, T, tt, needs_mask, tanh_bf16)
        x_idx = lambda b, t: (b, 0, t)
        if n_xbuf > 2:
            x_spec = pl.BlockSpec((1, C, tt), x_idx,
                                  pipeline_mode=pl.Buffered(n_xbuf))
        else:
            x_spec = pl.BlockSpec((1, C, tt), x_idx)
        return pl.pallas_call(
            kernel,
            out_shape=jax.ShapeDtypeStruct((B, 2 * C, 1), jnp.float32),
            grid_spec=pltpu.PrefetchScalarGridSpec(
                num_scalar_prefetch=0,
                grid=(B, num_t),
                in_specs=[
                    x_spec,                                          # x (NCT)
                    pl.BlockSpec((A, C), lambda b, t: (0, 0)),       # W1
                    pl.BlockSpec((A, 1), lambda b, t: (0, 0)),       # b1
                    pl.BlockSpec((C, A), lambda b, t: (0, 0)),       # W2
                    pl.BlockSpec((C, 1), lambda b, t: (0, 0)),       # b2
                ],
                out_specs=pl.BlockSpec((1, 2 * C, 1), lambda b, t: (b, 0, 0)),
                scratch_shapes=[pltpu.VMEM((C, 4), jnp.float32)],
            ),
            compiler_params=pltpu.CompilerParams(
                dimension_semantics=("parallel", "arbitrary"),
                vmem_limit_bytes=vmem_limit_final,
            ),
        )(x_nct, w1_bf, b1_2d, w2_bf, b2_2d)

    if want_bufs > 2:
        try:
            out = run(want_bufs)
        except Exception:
            # pipeline_mode / Buffered not supported on this jax version:
            # fall back to the default double-buffered x pipeline.
            out = run(2)
    else:
        out = run(2)

    return out[:, :, 0]                       # (B, 2C): mean rows then std rows


# --------------------------------------------------------------------------
# Pure-JAX reference mirroring the PyTorch forward.
# --------------------------------------------------------------------------
def _reference(x_nct, w1, b1, w2, b2, mxu_dtype=None, tanh_bf16=False):
    """If mxu_dtype is given, the attention-logit matmul operands are rounded
    to that dtype (mirrors the kernel's bf16 MXU feed); statistics stay f32.
    tanh_bf16 mirrors the kernel's bf16-EUP tanh path."""
    if mxu_dtype is not None:
        xw = x_nct.astype(mxu_dtype).astype(jnp.float32)
        w1c = w1.astype(mxu_dtype).astype(jnp.float32)
        w2c = w2.astype(mxu_dtype).astype(jnp.float32)
    else:
        xw, w1c, w2c = x_nct, w1, w2
    pre = jnp.einsum("ac,bct->bat", w1c, xw) + b1[None, :, None]
    if tanh_bf16:
        h = jnp.tanh(pre.astype(jnp.bfloat16)).astype(jnp.float32)
    else:
        h = jnp.tanh(pre)
    if mxu_dtype is not None:
        h = h.astype(mxu_dtype).astype(jnp.float32)
    e = jnp.einsum("ca,bat->bct", w2c, h) + b2[None, :, None]
    alpha = jax.nn.softmax(e, axis=2)
    mean = jnp.sum(alpha * x_nct, axis=2)
    resid = jnp.sum(alpha * x_nct ** 2, axis=2) - mean ** 2
    std = jnp.sqrt(jnp.clip(resid, 1e-9))
    return jnp.concatenate([mean, std], axis=1)


if __name__ == "__main__":
    B, C, A = 2, 32, 128          # batch, in_dim, attention_channels (default)

    key = jax.random.PRNGKey(0)
    kx1, kx2, kx3, kw1, kb1, kw2, kb2 = jax.random.split(key, 7)

    # Conv1d(in, out, kernel_size=1) weights with the kernel dim squeezed.
    w1 = 0.1 * jax.random.normal(kw1, (A, C), dtype=jnp.float32)
    b1 = 0.1 * jax.random.normal(kb1, (A,), dtype=jnp.float32)
    w2 = 0.1 * jax.random.normal(kw2, (C, A), dtype=jnp.float32)
    b2 = 0.1 * jax.random.normal(kb2, (C,), dtype=jnp.float32)

    _, tanh_bf16 = _tpu_hw_info()

    def check(x, out):
        ref_bf = _reference(x, w1, b1, w2, b2, mxu_dtype=jnp.bfloat16,
                            tanh_bf16=tanh_bf16)
        ref_f32 = _reference(x, w1, b1, w2, b2)
        assert out.shape == (x.shape[0], 2 * C), out.shape
        err_bf = float(jnp.max(jnp.abs(out - ref_bf)))
        err_f32 = float(jnp.max(jnp.abs(out - ref_f32)))
        assert jnp.allclose(out, ref_bf, atol=2e-2, rtol=2e-2), err_bf
        assert jnp.allclose(out, ref_f32, atol=1e-1, rtol=1e-1), err_f32

    # Case 1: short utterance -> single full-T time tile.
    T1 = 16
    x1 = jax.random.normal(kx1, (B, C, T1), dtype=jnp.float32)
    out1 = jax.block_until_ready(attentive_stats_pool(x1, w1, b1, w2, b2))
    check(x1, out1)

    # Case 2: forced small tile (128) -> 4 time steps, masked tail, and the
    # 3-deep x pipeline (pl.Buffered) path.
    T2 = 400
    x2 = jax.random.normal(kx2, (B, C, T2), dtype=jnp.float32)
    out2 = jax.block_until_ready(
        attentive_stats_pool(x2, w1, b1, w2, b2, max_time_tile=128))
    check(x2, out2)

    # Case 3: default auto tile derivation (fits a single large tile here).
    T3 = 1000
    x3 = jax.random.normal(kx3, (B, C, T3), dtype=jnp.float32)
    out3 = jax.block_until_ready(attentive_stats_pool(x3, w1, b1, w2, b2))
    check(x3, out3)

    print("KERNEL_OK")
</pallas_src>

<mosaic_0001>
module attributes {stable_mosaic.version = 11 : i64} {
  func.func @kernel(%arg0: i32, %arg1: i32, %arg2: memref<1x32x16xf32, #tpu.memory_space<vmem>>, %arg3: memref<128x32xbf16, #tpu.memory_space<vmem>>, %arg4: memref<128x1xf32, #tpu.memory_space<vmem>>, %arg5: memref<32x128xbf16, #tpu.memory_space<vmem>>, %arg6: memref<32x1xf32, #tpu.memory_space<vmem>>, %arg7: memref<1x64x1xf32, #tpu.memory_space<vmem>>, %arg8: memref<32x4xf32, #tpu.memory_space<vmem>>) attributes {dimension_semantics = [#tpu.dimension_semantics<parallel>, #tpu.dimension_semantics<arbitrary>], iteration_bounds = array<i64: 2, 1>, scalar_prefetch = 0 : i64, scratch_operands = 1 : i64, tpu.core_type = #tpu.core_type<tc>, window_params = [{transform_indices = @transform_0, window_bounds = array<i64: 1, 32, 16>}, {pipeline_mode = #tpu.pipeline_mode<synchronous>, transform_indices = @transform_1, window_bounds = array<i64: 128, 32>}, {pipeline_mode = #tpu.pipeline_mode<synchronous>, transform_indices = @transform_2, window_bounds = array<i64: 128, 1>}, {pipeline_mode = #tpu.pipeline_mode<synchronous>, transform_indices = @transform_3, window_bounds = array<i64: 32, 128>}, {pipeline_mode = #tpu.pipeline_mode<synchronous>, transform_indices = @transform_4, window_bounds = array<i64: 32, 1>}, {transform_indices = @transform_5, window_bounds = array<i64: 1, 64, 1>}]} {
    %c0_i32 = arith.constant 0 : i32
    %0 = arith.cmpi eq, %arg1, %c0_i32 : i32
    %1 = arith.extui %0 : i1 to i32
    %c0_i32_0 = arith.constant 0 : i32
    %2 = arith.cmpi ne, %1, %c0_i32_0 : i32
    scf.if %2 {
      %cst_31 = arith.constant 0.000000e+00 : f32
      %51 = vector.broadcast %cst_31 : f32 to vector<32x4xf32>
      %c0_32 = arith.constant 0 : index
      %c0_33 = arith.constant 0 : index
      %52 = vector.load %arg8[%c0_32, %c0_33] : memref<32x4xf32, #tpu.memory_space<vmem>>, vector<32x4xf32>
      tpu.vector_store %arg8[%c0_32, %c0_33], %51 {strides = array<i32>} : memref<32x4xf32, #tpu.memory_space<vmem>>, vector<32x4xf32>,
      %cst_34 = arith.constant 0xFF800000 : f32
      %53 = vector.broadcast %cst_34 : f32 to vector<32x1xf32>
      %c0_35 = arith.constant 0 : index
      %c0_36 = arith.constant 0 : index
      %54 = vector.load %arg8[%c0_35, %c0_36] : memref<32x4xf32, #tpu.memory_space<vmem>>, vector<32x1xf32>
      tpu.vector_store %arg8[%c0_35, %c0_36], %53 {strides = array<i32>} : memref<32x4xf32, #tpu.memory_space<vmem>>, vector<32x1xf32>,
    } else {
    }
    %c0 = arith.constant 0 : index
    %c0_1 = arith.constant 0 : index
    %c0_2 = arith.constant 0 : index
    %3 = vector.load %arg2[%c0, %c0_1, %c0_2] : memref<1x32x16xf32, #tpu.memory_space<vmem>>, vector<1x32x16xf32>
    %4 = vector.shape_cast %3 : vector<1x32x16xf32> to vector<32x16xf32>
    %c0_3 = arith.constant 0 : index
    %c0_4 = arith.constant 0 : index
    %5 = vector.load %arg3[%c0_3, %c0_4] : memref<128x32xbf16, #tpu.memory_space<vmem>>, vector<128x32xbf16>
    %6 = arith.truncf %4 : vector<32x16xf32> to vector<32x16xbf16>
    %cst = arith.constant dense<0.000000e+00> : vector<128x16xf32>
    %7 = tpu.matmul %5, %6, %cst {dimension_numbers = #tpu.dot_dimension_numbers<[1], [0], [0], [1], [0, 0, 1, 1], [], []>} : vector<128x32xbf16>, vector<32x16xbf16>, vector<128x16xf32> -> vector<128x16xf32>
    %c0_5 = arith.constant 0 : index
    %c0_6 = arith.constant 0 : index
    %8 = vector.load %arg4[%c0_5, %c0_6] : memref<128x1xf32, #tpu.memory_space<vmem>>, vector<128x1xf32>
    %9 = vector.broadcast %8 : vector<128x1xf32> to vector<128x16xf32>
    %10 = arith.addf %7, %9 : vector<128x16xf32>
    %11 = arith.truncf %10 : vector<128x16xf32> to vector<128x16xbf16>
    %12 = math.tanh %11 : vector<128x16xbf16>
    %c0_7 = arith.constant 0 : index
    %c0_8 = arith.constant 0 : index
    %13 = vector.load %arg5[%c0_7, %c0_8] : memref<32x128xbf16, #tpu.memory_space<vmem>>, vector<32x128xbf16>
    %cst_9 = arith.constant dense<0.000000e+00> : vector<32x16xf32>
    %14 = tpu.matmul %13, %12, %cst_9 {dimension_numbers = #tpu.dot_dimension_numbers<[1], [0], [0], [1], [0, 0, 1, 1], [], []>} : vector<32x128xbf16>, vector<128x16xbf16>, vector<32x16xf32> -> vector<32x16xf32>
    %c0_10 = arith.constant 0 : index
    %c0_11 = arith.constant 0 : index
    %15 = vector.load %arg6[%c0_10, %c0_11] : memref<32x1xf32, #tpu.memory_space<vmem>>, vector<32x1xf32>
    %16 = vector.broadcast %15 : vector<32x1xf32> to vector<32x16xf32>
    %17 = arith.addf %14, %16 : vector<32x16xf32>
    %c0_12 = arith.constant 0 : index
    %c0_13 = arith.constant 0 : index
    %18 = vector.load %arg8[%c0_12, %c0_13] : memref<32x4xf32, #tpu.memory_space<vmem>>, vector<32x1xf32>
    %c0_14 = arith.constant 0 : index
    %c1 = arith.constant 1 : index
    %19 = vector.load %arg8[%c0_14, %c1] : memref<32x4xf32, #tpu.memory_space<vmem>>, vector<32x1xf32>
    %c0_15 = arith.constant 0 : index
    %c2 = arith.constant 2 : index
    %20 = vector.load %arg8[%c0_15, %c2] : memref<32x4xf32, #tpu.memory_space<vmem>>, vector<32x1xf32>
    %c0_16 = arith.constant 0 : index
    %c3 = arith.constant 3 : index
    %21 = vector.load %arg8[%c0_16, %c3] : memref<32x4xf32, #tpu.memory_space<vmem>>, vector<32x1xf32>
    %cst_17 = arith.constant dense<0xFF800000> : vector<32xf32>
    %22 = vector.multi_reduction <maximumf>, %17, %cst_17 [1] : vector<32x16xf32> to vector<32xf32>
    %23 = vector.shape_cast %22 : vector<32xf32> to vector<32x1xf32>
    %24 = arith.maximumf %18, %23 : vector<32x1xf32>
    %25 = arith.subf %18, %24 : vector<32x1xf32>
    %26 = math.exp %25 : vector<32x1xf32>
    %27 = vector.broadcast %24 : vector<32x1xf32> to vector<32x16xf32>
    %28 = arith.subf %17, %27 : vector<32x16xf32>
    %29 = math.exp %28 : vector<32x16xf32>
    %30 = arith.mulf %29, %4 : vector<32x16xf32>
    %c0_18 = arith.constant 0 : index
    %c0_19 = arith.constant 0 : index
    %31 = vector.load %arg8[%c0_18, %c0_19] : memref<32x4xf32, #tpu.memory_space<vmem>>, vector<32x1xf32>
    tpu.vector_store %arg8[%c0_18, %c0_19], %24 {strides = array<i32>} : memref<32x4xf32, #tpu.memory_space<vmem>>, vector<32x1xf32>,
    %32 = arith.mulf %26, %19 : vector<32x1xf32>
    %cst_20 = arith.constant dense<0.000000e+00> : vector<32xf32>
    %33 = vector.multi_reduction <add>, %29, %cst_20 [1] : vector<32x16xf32> to vector<32xf32>
    %34 = vector.shape_cast %33 : vector<32xf32> to vector<32x1xf32>
    %35 = arith.addf %32, %34 : vector<32x1xf32>
    %c0_21 = arith.constant 0 : index
    %c1_22 = arith.constant 1 : index
    %36 = vector.load %arg8[%c0_21, %c1_22] : memref<32x4xf32, #tpu.memory_space<vmem>>, vector<32x1xf32>
    tpu.vector_store %arg8[%c0_21, %c1_22], %35 {strides = array<i32>} : memref<32x4xf32, #tpu.memory_space<vmem>>, vector<32x1xf32>,
    %37 = arith.mulf %26, %20 : vector<32x1xf32>
    %cst_23 = arith.constant dense<0.000000e+00> : vector<32xf32>
    %38 = vector.multi_reduction <add>, %30, %cst_23 [1] : vector<32x16xf32> to vector<32xf32>
    %39 = vector.shape_cast %38 : vector<32xf32> to vector<32x1xf32>
    %40 = arith.addf %37, %39 : vector<32x1xf32>
    %c0_24 = arith.constant 0 : index
    %c2_25 = arith.constant 2 : index
    %41 = vector.load %arg8[%c0_24, %c2_25] : memref<32x4xf32, #tpu.memory_space<vmem>>, vector<32x1xf32>
    tpu.vector_store %arg8[%c0_24, %c2_25], %40 {strides = array<i32>} : memref<32x4xf32, #tpu.memory_space<vmem>>, vector<32x1xf32>,
    %42 = arith.mulf %26, %21 : vector<32x1xf32>
    %43 = arith.mulf %30, %4 : vector<32x16xf32>
    %cst_26 = arith.constant dense<0.000000e+00> : vector<32xf32>
    %44 = vector.multi_reduction <add>, %43, %cst_26 [1] : vector<32x16xf32> to vector<32xf32>
    %45 = vector.shape_cast %44 : vector<32xf32> to vector<32x1xf32>
    %46 = arith.addf %42, %45 : vector<32x1xf32>
    %c0_27 = arith.constant 0 : index
    %c3_28 = arith.constant 3 : index
    %47 = vector.load %arg8[%c0_27, %c3_28] : memref<32x4xf32, #tpu.memory_space<vmem>>, vector<32x1xf32>
    tpu.vector_store %arg8[%c0_27, %c3_28], %46 {strides = array<i32>} : memref<32x4xf32, #tpu.memory_space<vmem>>, vector<32x1xf32>,
    %c0_i32_29 = arith.constant 0 : i32
    %48 = arith.cmpi eq, %arg1, %c0_i32_29 : i32
    %49 = arith.extui %48 : i1 to i32
    %c0_i32_30 = arith.constant 0 : i32
    %50 = arith.cmpi ne, %49, %c0_i32_30 : i32
    scf.if %50 {
      %c0_31 = arith.constant 0 : index
      %c1_32 = arith.constant 1 : index
      %51 = vector.load %arg8[%c0_31, %c1_32] : memref<32x4xf32, #tpu.memory_space<vmem>>, vector<32x1xf32>
      %52 = tpu.reciprocal %51 : vector<32x1xf32> -> vector<32x1xf32>
      %c0_33 = arith.constant 0 : index
      %c2_34 = arith.constant 2 : index
      %53 = vector.load %arg8[%c0_33, %c2_34] : memref<32x4xf32, #tpu.memory_space<vmem>>, vector<32x1xf32>
      %54 = arith.mulf %53, %52 : vector<32x1xf32>
      %c0_35 = arith.constant 0 : index
      %c3_36 = arith.constant 3 : index
      %55 = vector.load %arg8[%c0_35, %c3_36] : memref<32x4xf32, #tpu.memory_space<vmem>>, vector<32x1xf32>
      %56 = arith.mulf %55, %52 : vector<32x1xf32>
      %57 = arith.mulf %54, %54 : vector<32x1xf32>
      %58 = arith.subf %56, %57 : vector<32x1xf32>
      %cst_37 = arith.constant 9.99999971E-10 : f32
      %59 = vector.broadcast %cst_37 : f32 to vector<32x1xf32>
      %60 = arith.maximumf %58, %59 : vector<32x1xf32>
      %61 = math.sqrt %60 : vector<32x1xf32>
      %c0_38 = arith.constant 0 : index
      %c0_39 = arith.constant 0 : index
      %c0_40 = arith.constant 0 : index
      %62 = vector.load %arg7[%c0_38, %c0_39, %c0_40] : memref<1x64x1xf32, #tpu.memory_space<vmem>>, vector<1x32x1xf32>
      %63 = vector.shape_cast %62 : vector<1x32x1xf32> to vector<32x1xf32>
      %64 = vector.shape_cast %54 : vector<32x1xf32> to vector<1x32x1xf32>
      tpu.vector_store %arg7[%c0_38, %c0_39, %c0_40], %64 {strides = array<i32>} : memref<1x64x1xf32, #tpu.memory_space<vmem>>, vector<1x32x1xf32>,
      %c0_41 = arith.constant 0 : index
      %c32 = arith.constant 32 : index
      %c0_42 = arith.constant 0 : index
      %65 = vector.load %arg7[%c0_41, %c32, %c0_42] : memref<1x64x1xf32, #tpu.memory_space<vmem>>, vector<1x32x1xf32>
      %66 = vector.shape_cast %65 : vector<1x32x1xf32> to vector<32x1xf32>
      %67 = vector.shape_cast %61 : vector<32x1xf32> to vector<1x32x1xf32>
      tpu.vector_store %arg7[%c0_41, %c32, %c0_42], %67 {strides = array<i32>} : memref<1x64x1xf32, #tpu.memory_space<vmem>>, vector<1x32x1xf32>,
    } else {
    }
    return
  }
  func.func @transform_0(%arg0: i32, %arg1: i32) -> (i32, i32, i32) {
    %c0_i32 = arith.constant 0 : i32
    %c0_i32_0 = arith.constant 0 : i32
    return %arg0, %c0_i32, %arg1 : i32, i32, i32
  }
  func.func @transform_1(%arg0: i32, %arg1: i32) -> (i32, i32) {
    %c0_i32 = arith.constant 0 : i32
    %c0_i32_0 = arith.constant 0 : i32
    %c0_i32_1 = arith.constant 0 : i32
    return %c0_i32, %c0_i32_0 : i32, i32
  }
  func.func @transform_2(%arg0: i32, %arg1: i32) -> (i32, i32) {
    %c0_i32 = arith.constant 0 : i32
    %c0_i32_0 = arith.constant 0 : i32
    %c0_i32_1 = arith.constant 0 : i32
    return %c0_i32, %c0_i32_0 : i32, i32
  }
  func.func @transform_3(%arg0: i32, %arg1: i32) -> (i32, i32) {
    %c0_i32 = arith.constant 0 : i32
    %c0_i32_0 = arith.constant 0 : i32
    %c0_i32_1 = arith.constant 0 : i32
    return %c0_i32, %c0_i32_0 : i32, i32
  }
  func.func @transform_4(%arg0: i32, %arg1: i32) -> (i32, i32) {
    %c0_i32 = arith.constant 0 : i32
    %c0_i32_0 = arith.constant 0 : i32
    %c0_i32_1 = arith.constant 0 : i32
    return %c0_i32, %c0_i32_0 : i32, i32
  }
  func.func @transform_5(%arg0: i32, %arg1: i32) -> (i32, i32, i32) {
    %c0_i32 = arith.constant 0 : i32
    %c0_i32_0 = arith.constant 0 : i32
    %c0_i32_1 = arith.constant 0 : i32
    return %arg0, %c0_i32, %c0_i32_0 : i32, i32, i32
  }
}

</mosaic_0001>

<bundles_post_ra>
// kernel: tpu_custom_call.1
= control target key start
LH: loop header
LB: loop body
LE: loop exit
PB: predicated region body
PF: predicated region fallthrough
CT: control target
= control target key end

     0   :  { %s1348_s18 = smov 0   ;;  %s1350_s19 = smov 0   ;;  %s1647_s0 = inlined_call_operand.vmem [shape: f32[2,32,16], index: 0, kind: input, shape index: {}]   ;;  %s1648_s1 = inlined_call_operand.vmem [shape: bf16[128,32], index: 1, kind: input, shape index: {}]   ;;  %s1649_s2 = inlined_call_operand.vmem [shape: f32[128,1], index: 2, kind: input, shape index: {}]   ;;  %s1650_s3 = inlined_call_operand.vmem [shape: bf16[32,128], index: 3, kind: input, shape index: {}]   ;;  %s1651_s4 = inlined_call_operand.vmem [shape: f32[32,1], index: 4, kind: input, shape index: {}]   ;;  %s1652_s5 = inlined_call_operand.vmem [shape: f32[2,64,1], index: 5, kind: output, shape index: {}]  }
   0x1   :  { %s1352_s20 = smov 0  }
   0x2 LB: > { %s27_s21 = sadd.s32 1, %s1303_s19  ;;  %p1105_p0 = scmp.ge.s32.totalorder %s1307_s20, 1  ;;  %s1307_s20 = sphi %s1352_s20, %s15_s20   ;;  %s1303_s19 = sphi %s1350_s19, %s1654_s19   ;;  %s1299_s18 = sphi %s1348_s18, %s1653_s18  }
   0x3   : > { %p29_p1 = scmp.ge.s32.totalorder %s27_s21, 2  ;;  %p204_p2 = scmp.lt.s32.totalorder %s1307_s20, 3 }
   0x5   : > { %s1656_s21 = smov (%p29_p1, %s27_s21), 0  ;;  %p205_p3 = pnand %p1105_p0, %p204_p2 }
   0x6   : > { %p235_p4 = scmp.lt.s32.totalorder (!%p205_p3), %s1299_s18, 1  ;;  %v1227_v0 = vld [vmem:[%s1648_s1] sm:$0xff] (!%p205_p3)   ;;  %vm421_vm0 = vcmask (!%p205_p3), 261120   ;;  %v1309_v1 = vmov (!%p205_p3), 0   ;;  %v287_v9 = vld [vmem:[%s1649_s2 + $0x10] sm:$0xff] (!%p205_p3)  ;;  %v286_v10 = vld [vmem:[%s1649_s2 + $0x8] sm:$0xff] (!%p205_p3) }
   0x7   : > { %208 = sbr.rel (%p205_p3) target bundleno = 1476 (0x5c4), region = 40  ;;  %1156 = vmatprep.mubr.msk.bf16.mxu0 (!%p205_p3), %vm421_vm0, %v1227_v0  ;;  %1225 = vset.pattern.permute.xlu0 (!%p205_p3), %v1309_v1  ;;  %v285_v8 = vld [vmem:[%s1649_s2] sm:$0xff] (!%p205_p3)  ;;  %v288_v11 = vld [vmem:[%s1649_s2 + $0x18] sm:$0xff] (!%p205_p3)  ;;  %v1228_v12 = vld [vmem:[%s1648_s1 + $0x8] sm:$0xff] (!%p205_p3)   ;;  %vm253_vm1 = vcmask (!%p205_p3), 31744   ;;  %vm258_vm2 = vcmask (!%p205_p3), 7168  }
   0x8   : > { %1226 = vset.pattern.permute.xlu1 (!%p205_p3), %v1309_v1  ;;  %303 = vperm.xlu0 (!%p205_p3), %1225, %v285_v8   ;;  %v1229_v13 = vld [vmem:[%s1648_s1 + $0x10] sm:$0xff] (!%p205_p3)   ;;  %v289_v14 = vld [vmem:[%s1649_s2 + $0x20] sm:$0xff] (!%p205_p3)  ;;  %v290_v15 = vld [vmem:[%s1649_s2 + $0x28] sm:$0xff] (!%p205_p3)  ;;  %vm652_vm3 = vcmask (!%p205_p3), 130048   ;;  %s1312_s23 = smov (!%p205_p3), 127   ;;  %s1314_s25 = smov (!%p205_p3), 125  }
   0x9   : > { %313 = vperm.xlu1 (!%p205_p3), %1226, %v287_v9   ;;  %v291_v16 = vld [vmem:[%s1649_s2 + $0x30] sm:$0xff] (!%p205_p3)  ;;  %v292_v17 = vld [vmem:[%s1649_s2 + $0x38] sm:$0xff] (!%p205_p3)  ;;  %v1231_v19 = vld [vmem:[%s1648_s1 + $0x20] sm:$0xff] (!%p205_p3)   ;;  %s1315_s26 = smov (!%p205_p3), 1   ;;  %s1317_s28 = smov (!%p205_p3), 3   ;;  %vm774_vm4 = vcmask (!%p205_p3), 15368  }
   0xa   : > { %v1230_v18 = vld [vmem:[%s1648_s1 + $0x18] sm:$0xff] (!%p205_p3)   ;;  %v293_v20 = vld [vmem:[%s1649_s2 + $0x40] sm:$0xff] (!%p205_p3)  ;;  %v294_v21 = vld [vmem:[%s1649_s2 + $0x48] sm:$0xff] (!%p205_p3)  ;;  %vm827_vm5 = vcmask (!%p205_p3), 23568   ;;  %vm884_vm6 = vcmask (!%p205_p3), 31768  }
   0xb   : > { %v295_v22 = vld [vmem:[%s1649_s2 + $0x50] sm:$0xff] (!%p205_p3)  ;;  %v296_v23 = vld [vmem:[%s1649_s2 + $0x58] sm:$0xff] (!%p205_p3)  ;;  %v1232_v24 = vld [vmem:[%s1648_s1 + $0x28] sm:$0xff] (!%p205_p3)  }
   0xc   : > { %308 = vperm.xlu0 (!%p205_p3), %1225, %v286_v10   ;;  %v1233_v25 = vld [vmem:[%s1648_s1 + $0x30] sm:$0xff] (!%p205_p3)   ;;  %v297_v26 = vld [vmem:[%s1649_s2 + $0x60] sm:$0xff] (!%p205_p3)  ;;  %v298_v27 = vld [vmem:[%s1649_s2 + $0x68] sm:$0xff] (!%p205_p3) }
   0xd   : > { %318 = vperm.xlu1 (!%p205_p3), %1226, %v288_v11   ;;  %v299_v28 = vld [vmem:[%s1649_s2 + $0x70] sm:$0xff] (!%p205_p3)  ;;  %v300_v29 = vld [vmem:[%s1649_s2 + $0x78] sm:$0xff] (!%p205_p3)  ;;  %v563_v31 = vld [vmem:[%s1651_s4] sm:$0xff] (!%p205_p3) }
   0xe   : > { %s1658_s18 = smov (!%p235_p4, %s1299_s18), 1  ;;  %v1234_v30 = vld [vmem:[%s1648_s1 + $0x38] sm:$0xff]   ;;  %v564_v32 = vld [vmem:[%s1651_s4 + $0x8] sm:$0xff]  ;;  %v565_v33 = vld [vmem:[%s1651_s4 + $0x10] sm:$0xff] }
   0xf   : > { %s1130_s24 = sshll.u32 %s1658_s18, 5  ;;  %v566_v34 = vld [vmem:[%s1651_s4 + $0x18] sm:$0xff]  ;;  %v1235_v35 = vld [vmem:[%s1650_s3] sm:$0xff]   ;;  %s1131_s29 = sshll.u32 %s1658_s18, 6 }
  0x10   : > { %s242_s27 = scalar_lea.vmem %s1647_s0, %s1130_s24  ;;  %323 = vperm.xlu0 %1225, %v289_v14   ;;  %1188 = vmatprep.mubr.bf16.mxu1 %v1235_v35  ;;  %s1313_s24 = smov 126  }
  0x11   : > { %v1376_v2 = vld [vmem:[%s242_s27] sm:$0xff]  ;;  %v1378_v3 = vld [vmem:[%s242_s27 + $0x8] sm:$0xff]  ;;  %v1380_v4 = vld [vmem:[%s242_s27 + $0x10] sm:$0xff]  ;;  %328 = vperm.xlu1 %1226, %v290_v15   ;;  %s1616_s7 = scalar_lea.vmem %s1652_s5, %s1131_s29 }
  0x12   : > { %v283_v5 = vpack.c.bf16 %v1378_v3, %v1376_v2  ;;  %v1384_v6 = vld [vmem:[%s242_s27 + $0x18] sm:$0xff]  ;;  %s1316_s27 = smov 2  }
  0x13   : > { %v284_v7 = vpack.c.bf16 %v1384_v6, %v1380_v4 }
  0x14   : > { %1152 = vmatprep.subr.bf16.mxu0 %v283_v5  ;;  %333 = vperm.xlu0 %1225, %v291_v16  }
  0x15   : > { %1153 = vmatpush3.bf16.msra.mxu0 %v283_v5  ;;  %338 = vperm.xlu1 %1226, %v292_v17  }
  0x16   : > { %1154 = vmatprep.subr.bf16.mxu0 %v284_v7 }
  0x18   : > { %343 = vperm.xlu0 %1225, %v293_v20  }
  0x19   : > { %1155 = vmatpush3.bf16.msra.mxu0 %v284_v7  ;;  %348 = vperm.xlu1 %1226, %v294_v21  }
  0x1c   : > { %1157 = vmatmul.mubr.msk.bf16.vlgmr.msra.gmra.mrb[0].mxu0 %vm421_vm0, %v1228_v12  ;;  %353 = vperm.xlu0 %1225, %v295_v22  }
  0x1d   : > { %1160 = vmatprep.mubr.msk.bf16.mxu0 %vm421_vm0, %v1229_v13  ;;  %358 = vperm.xlu1 %1226, %v296_v23  }
  0x20   : > { %363 = vperm.xlu0 %1225, %v297_v26  }
  0x21   : > { %368 = vperm.xlu1 %1226, %v298_v27  }
  0x24   : > { %1161 = vmatmul.mubr.msk.bf16.gmra.mrb[4].mxu0 %vm421_vm0, %v1230_v18  ;;  %373 = vperm.xlu0 %1225, %v299_v28  }
  0x25   : > { %1164 = vmatprep.mubr.msk.bf16.mxu0 %vm421_vm0, %v1231_v19  ;;  %378 = vperm.xlu1 %1226, %v300_v29  }
  0x28   : > { %569 = vperm.xlu0 %1225, %v563_v31  }
  0x29   : > { %574 = vperm.xlu1 %1226, %v564_v32  }
  0x2c   : > { %1165 = vmatmul.mubr.msk.bf16.gmra.mrb[8].mxu0 %vm421_vm0, %v1232_v24  ;;  %579 = vperm.xlu0 %1225, %v565_v33  }
  0x2d   : > { %1168 = vmatprep.mubr.msk.bf16.mxu0 %vm421_vm0, %v1233_v25  ;;  %584 = vperm.xlu1 %1226, %v566_v34  }
  0x34   : > { %1169 = vmatmul.mubr.msk.bf16.gmra.mrb[12].mxu0 %vm421_vm0, %v1234_v30 }
  0x87   : > { %v304_v36 = vpop.permute.xlu0 %303 }
  0x88   : > { %v314_v37 = vpop.permute.xlu1 %313 }
  0x8b   : > { %v309_v38 = vpop.permute.xlu0 %308 }
  0x8c   : > { %v319_v39 = vpop.permute.xlu1 %318 }
  0x8f   : > { %v324_v40 = vpop.permute.xlu0 %323 }
  0x90   : > { %v329_v41 = vpop.permute.xlu1 %328 }
  0x93   : > { %v334_v43 = vpop.permute.xlu0 %333 }
  0x94   : > { %v339_v45 = vpop.permute.xlu1 %338 }
  0x97   : > { %v344_v54 = vpop.permute.xlu0 %343 }
  0x98   : > { %v349_v55 = vpop.permute.xlu1 %348 }
  0x9b   : > { %v354_v0 = vpop.permute.xlu0 %353 }
  0x9c   : > { %v359_v5 = vpop.permute.xlu1 %358 }
  0x9f   : > { %v364_v12 = vpop.permute.xlu0 %363 }
  0xa0   : > { %v369_v16 = vpop.permute.xlu1 %368 }
  0xa3   : > { %v374_v23 = vpop.permute.xlu0 %373 }
  0xa4   : > { %v379_v25 = vpop.permute.xlu1 %378 }
  0xef   : > { %v1158_v42 = vpop.f32.mrb[0].mxu0 }
  0xf0   : > { %v480_v44 = vpop.f32.mrb[1].mxu0  ;;  %v489_v47 = vadd.f32 %v1158_v42, %v314_v37  ;;  %v1311_v42 = vmov -inf  }
  0xf1   : > { %v1159_v46 = vpop.f32.mrb[2].mxu0  ;;  %v481_v50 = vadd.f32 %v480_v44, %v304_v36 }
  0xf2   : > { %v492_v48 = vadd.f32 %v1159_v46, %v319_v39  ;;  %v483_v49 = vpop.f32.mrb[3].mxu0 }
  0xf3   : > { %v484_v51 = vadd.f32 %v483_v49, %v309_v38 }
  0xf4   : > { %v544_v52 = vpack.c.bf16 %v492_v48, %v489_v47 }
  0xf5   : > { %v543_v53 = vpack.c.bf16 %v484_v51, %v481_v50 }
  0xf7   : > { %1237 = vtanh.bf16 %v543_v53  ;;  %v1162_v56 = vpop.f32.mrb[4].mxu0 }
  0xf8   : > { %v496_v57 = vpop.f32.mrb[5].mxu0  ;;  %1239 = vtanh.bf16 %v544_v52  ;;  %v505_v59 = vadd.f32 %v1162_v56, %v334_v43  ;;  %v570_v43 = vpop.permute.xlu0 %569 }
  0xf9   : > { %v1163_v58 = vpop.f32.mrb[6].mxu0  ;;  %v497_v62 = vadd.f32 %v496_v57, %v324_v40  ;;  %v1236_v40 = vld [vmem:[%s1650_s3 + $0x8] sm:$0xff]  }
  0xfa   : > { %v508_v60 = vadd.f32 %v1163_v58, %v339_v45  ;;  %v499_v61 = vpop.f32.mrb[7].mxu0  ;;  %v575_v45 = vpop.permute.xlu1 %574 }
  0xfb   : > { %v500_v63 = vadd.f32 %v499_v61, %v329_v41  ;;  %v1310_v41 = vmov 0.0  }
  0xfc   : > { %v546_v1 = vpack.c.bf16 %v508_v60, %v505_v59  ;;  %255 = vst.msk [vmem:[#allocation2 + $0x8] sm:$0xff] %vm253_vm1, %v1310_v41  ;;  %254 = vst.msk [vmem:[#allocation2] sm:$0xff] %vm253_vm1, %v1310_v41  ;;  %v580_v49 = vpop.permute.xlu0 %579 }
  0xfd   : > { %v545_v7 = vpack.c.bf16 %v500_v63, %v497_v62  ;;  %256 = vst.msk [vmem:[#allocation2 + $0x10] sm:$0xff] %vm253_vm1, %v1310_v41  ;;  %257 = vst.msk [vmem:[#allocation2 + $0x18] sm:$0xff] %vm253_vm1, %v1310_v41 }
  0xfe   : > { %260 = vst.msk [vmem:[#allocation2 + $0x8] sm:$0xff] %vm258_vm2, %v1311_v42  ;;  %259 = vst.msk [vmem:[#allocation2] sm:$0xff] %vm258_vm2, %v1311_v42 }
  0xff   : > { %1241 = vtanh.bf16 %v545_v7  ;;  %v1166_v8 = vpop.f32.mrb[8].mxu0  ;;  %261 = vst.msk [vmem:[#allocation2 + $0x10] sm:$0xff] %vm258_vm2, %v1311_v42  ;;  %262 = vst.msk [vmem:[#allocation2 + $0x18] sm:$0xff] %vm258_vm2, %v1311_v42 }
 0x100   : > { %v512_v9 = vpop.f32.mrb[9].mxu0  ;;  %1243 = vtanh.bf16 %v546_v1  ;;  %v521_v13 = vadd.f32 %v1166_v8, %v354_v0 }
 0x101   : > { %v1167_v10 = vpop.f32.mrb[10].mxu0  ;;  %v513_v17 = vadd.f32 %v512_v9, %v344_v54 }
 0x102   : > { %v1238_v11 = vpop.eup %1237  ;;  %v524_v14 = vadd.f32 %v1167_v10, %v359_v5  ;;  %v515_v15 = vpop.f32.mrb[11].mxu0 }
 0x103   : > { %v516_v18 = vadd.f32 %v515_v15, %v349_v55  ;;  %1172 = vmatprep.subr.bf16.mxu1 %v1238_v11  ;;  %v1240_v19 = vpop.eup %1239  ;;  %v585_v55 = vpop.permute.xlu1 %584 }
 0x104   : > { %v548_v20 = vpack.c.bf16 %v524_v14, %v521_v13  ;;  %1173 = vmatpush3.bf16.msra.mxu1 %v1238_v11 }
 0x105   : > { %v547_v21 = vpack.c.bf16 %v516_v18, %v513_v17  ;;  %1174 = vmatprep.subr.bf16.mxu1 %v1240_v19  ;;  %v649_v59 = vld [vmem:[#allocation2 + $0x8] sm:$0xff]  ;;  %v648_v60 = vld [vmem:[#allocation2] sm:$0xff] }
 0x106   : > { %v1504_v61 = vld [vmem:[#allocation2 + $0x10] sm:$0xff]  ;;  %v1512_v11 = vld [vmem:[#allocation2 + $0x18] sm:$0xff] }
 0x107   : > { %1245 = vtanh.bf16 %v547_v21  ;;  %v1170_v22 = vpop.f32.mrb[12].mxu0 }
 0x108   : > { %v528_v24 = vpop.f32.mrb[13].mxu0  ;;  %1175 = vmatpush3.bf16.msra.mxu1 %v1240_v19  ;;  %1247 = vtanh.bf16 %v548_v20  ;;  %v537_v28 = vadd.f32 %v1170_v22, %v374_v23 }
 0x109   : > { %v1171_v26 = vpop.f32.mrb[14].mxu0  ;;  %v529_v31 = vadd.f32 %v528_v24, %v364_v12 }
 0x10a   : > { %v1242_v27 = vpop.eup %1241  ;;  %v540_v29 = vadd.f32 %v1171_v26, %v379_v25  ;;  %v531_v30 = vpop.f32.mrb[15].mxu0 }
 0x10b   : > { %v532_v32 = vadd.f32 %v531_v30, %v369_v16  ;;  %1176 = vmatprep.subr.bf16.mxu1 %v1242_v27  ;;  %v1244_v33 = vpop.eup %1243 }
 0x10c   : > { %v550_v34 = vpack.c.bf16 %v540_v29, %v537_v28  ;;  %1177 = vmatpush3.bf16.msra.mxu1 %v1242_v27 }
 0x10d   : > { %v549_v35 = vpack.c.bf16 %v532_v32, %v529_v31  ;;  %1178 = vmatprep.subr.bf16.mxu1 %v1244_v33 }
 0x10f   : > { %1249 = vtanh.bf16 %v549_v35 }
 0x110   : > { %1179 = vmatpush3.bf16.msra.mxu1 %v1244_v33  ;;  %1251 = vtanh.bf16 %v550_v34 }
 0x112   : > { %v1246_v36 = vpop.eup %1245 }
 0x113   : > { %1180 = vmatprep.subr.bf16.mxu1 %v1246_v36  ;;  %v1248_v37 = vpop.eup %1247 }
 0x114   : > { %1181 = vmatpush3.bf16.msra.mxu1 %v1246_v36 }
 0x115   : > { %1182 = vmatprep.subr.bf16.mxu1 %v1248_v37 }
 0x118   : > { %1183 = vmatpush3.bf16.msra.mxu1 %v1248_v37 }
 0x11a   : > { %v1250_v38 = vpop.eup %1249 }
 0x11b   : > { %1184 = vmatprep.subr.bf16.mxu1 %v1250_v38  ;;  %v1252_v39 = vpop.eup %1251 }
 0x11c   : > { %1185 = vmatpush3.bf16.msra.mxu1 %v1250_v38 }
 0x11d   : > { %1186 = vmatprep.subr.bf16.mxu1 %v1252_v39 }
 0x120   : > { %1187 = vmatpush3.bf16.msra.mxu1 %v1252_v39 }
 0x123   : > { %1189 = vmatmul.mubr.bf16.vlgmr.msra.gmra.mrb[0].mxu1 %v1236_v40 }
 0x1f6   : > { %v1190_v44 = vpop.f32.mrb[0].mxu1 }
 0x1f7   : > { %v633_v46 = vpop.f32.mrb[1].mxu1  ;;  %v1488_v51 = vadd.f32 %v1190_v44, %v580_v49 }
 0x1f8   : > { %v1486_v47 = vadd.f32 %v633_v46, %v570_v43  ;;  %v1191_v48 = vpop.f32.mrb[2].mxu1 }
 0x1f9   : > { %v636_v50 = vpop.f32.mrb[3].mxu1  ;;  %v1496_v56 = vadd.f32 %v1191_v48, %v585_v55  ;;  %v659_v57 = vsel %vm652_vm3, %v1488_v51, -inf }
 0x1fa   : > { %v1490_v52 = vadd.f32 %v636_v50, %v575_v45  ;;  %v653_v53 = vsel %vm652_vm3, %v1486_v47, -inf }
 0x1fb   : > { %654 = vmax.xlane.f32.xlu0 %v653_v53  ;;  %v662_v58 = vsel %vm652_vm3, %v1496_v56, -inf }
 0x1fc   : > { %v656_v54 = vsel %vm652_vm3, %v1490_v52, -inf }
 0x1fd   : > { %657 = vmax.xlane.f32.xlu1 %v656_v54 }
 0x1ff   : > { %660 = vmax.xlane.f32.xlu0 %v659_v57 }
 0x203   : > { %663 = vmax.xlane.f32.xlu0 %v662_v58 }
 0x219   : > { %728 = vrot.lane.b32.xlu0 %v649_v59, %s1312_s23 }
 0x21d   : > { %779 = vrot.lane.b32.xlu0 %v648_v60, %s1313_s24 }
 0x221   : > { %783 = vrot.lane.b32.xlu0 %v1504_v61, %s1313_s24 }
 0x225   : > { %832 = vrot.lane.b32.xlu0 %v648_v60, %s1314_s25 }
 0x288   : > { %v655_v62 = vpop.xlane.xlu0 %654 }
 0x289   : > { %v665_v63 = vmax.f32 %v648_v60, %v655_v62 }
 0x28a   : > { %v658_v0 = vpop.xlane.xlu1 %657 }
 0x28b   : > { %v669_v1 = vsub.f32 %v648_v60, %v665_v63  ;;  %718 = vst.msk [vmem:[#allocation2] sm:$0xff] %vm258_vm2, %v665_v63  ;;  %v666_v5 = vmax.f32 %v649_v59, %v658_v0 }
 0x28c   : > { %v661_v7 = vpop.xlane.xlu0 %660 }
 0x28d   : > { %v673_v8 = vmul.f32 1.442695, %v669_v1  ;;  %v670_v9 = vsub.f32 %v649_v59, %v666_v5  ;;  %719 = vst.msk [vmem:[#allocation2 + $0x8] sm:$0xff] %vm258_vm2, %v666_v5  ;;  %v667_v10 = vmax.f32 %v1504_v61, %v661_v7  ;;  %688 = vperm.xlu0 %1225, %v666_v5  }
 0x28f   : > { %1253 = vpow2.f32 %v673_v8  ;;  %v675_v12 = vmul.f32 1.442695, %v670_v9  ;;  %v671_v13 = vsub.f32 %v1504_v61, %v667_v10  ;;  %720 = vst.msk [vmem:[#allocation2 + $0x10] sm:$0xff] %vm258_vm2, %v667_v10  ;;  %693 = vperm.xlu1 %1226, %v667_v10  }
 0x290   : > { %v664_v14 = vpop.xlane.xlu0 %663 }
 0x291   : > { %1255 = vpow2.f32 %v675_v12  ;;  %v677_v15 = vmul.f32 1.442695, %v671_v13  ;;  %v1517_v16 = vmax.f32 %v1512_v11, %v664_v14 }
 0x293   : > { %1257 = vpow2.f32 %v677_v15  ;;  %721 = vst.msk [vmem:[#allocation2 + $0x18] sm:$0xff] %vm258_vm2, %v1517_v16  ;;  %683 = vperm.xlu1 %1226, %v665_v63   ;;  %v672_v1 = vsub.f32 %v1512_v11, %v1517_v16 }
 0x294   : > { %v729_v17 = vpop.permute.xlu0 %728 }
 0x295   : > { %v679_v5 = vmul.f32 1.442695, %v672_v1 }
 0x297   : > { %698 = vperm.xlu1 %1226, %v1517_v16  }
 0x298   : > { %v780_v18 = vpop.permute.xlu0 %779 }
 0x299   : > { %v1522_v19 = vpop.eup %1253 }
 0x29a   : > { %v1525_v20 = vmul.f32 %v1522_v19, %v780_v18 }
 0x29b   : > { %v1527_v21 = vpop.eup %1255  ;;  %726 = vrot.lane.b32.xlu1 %v648_v60, %s1312_s23 }
 0x29c   : > { %v1531_v22 = vmul.f32 %v1527_v21, %v729_v17  ;;  %v784_v23 = vpop.permute.xlu0 %783 }
 0x29d   : > { %v1533_v24 = vpop.eup %1257 }
 0x29e   : > { %v1536_v25 = vmul.f32 %v1533_v24, %v784_v23 }
 0x29f   : > { %730 = vrot.lane.b32.xlu1 %v1504_v61, %s1312_s23 }
 0x2a0   : > { %v1546_v26 = vpop.permute.xlu0 %832 }
 0x2a3   : > { %732 = vrot.lane.b32.xlu1 %v1512_v11, %s1312_s23 }
 0x2a7   : > { %781 = vrot.lane.b32.xlu1 %v649_v59, %s1313_s24 }
 0x2ab   : > { %785 = vrot.lane.b32.xlu1 %v1512_v11, %s1313_s24 }
 0x2af   : > { %834 = vrot.lane.b32.xlu1 %v649_v59, %s1314_s25 }
 0x30c   : > { %v689_v27 = vpop.permute.xlu0 %688 }
 0x30d   : > { %v702_v28 = vsub.f32 %v1490_v52, %v689_v27 }
 0x30e   : > { %v694_v29 = vpop.permute.xlu1 %693 }
 0x30f   : > { %v703_v30 = vsub.f32 %v1488_v51, %v694_v29  ;;  %v707_v32 = vmul.f32 1.442695, %v702_v28 }
 0x311   : > { %v709_v31 = vmul.f32 1.442695, %v703_v30 }
 0x312   : > { %v684_v33 = vpop.permute.xlu1 %683 }
 0x313   : > { %1259 = vpow2.f32 %v709_v31  ;;  %v701_v34 = vsub.f32 %v1486_v47, %v684_v33 }
 0x314   : > { %1261 = vpow2.f32 %v707_v32 }
 0x315   : > { %v705_v35 = vmul.f32 1.442695, %v701_v34 }
 0x316   : > { %v699_v36 = vpop.permute.xlu1 %698 }
 0x317   : > { %1263 = vpow2.f32 %v705_v35  ;;  %v704_v37 = vsub.f32 %v1496_v56, %v699_v36 }
 0x319   : > { %v711_v38 = vmul.f32 1.442695, %v704_v37 }
 0x31b   : > { %1265 = vpow2.f32 %v711_v38 }
 0x31c   : > { %1267 = vpow2.f32 %v679_v5 }
 0x31d   : > { %v1260_v39 = vpop.eup %1259 }
 0x31e   : > { %v748_v40 = vsel %vm652_vm3, %v1260_v39, 0.0  ;;  %v715_v41 = vmul.f32 %v1260_v39, %v1380_v4  ;;  %v1262_v42 = vpop.eup %1261 }
 0x31f   : > { %749 = vadd.xlane.f32.xlu0 %v748_v40  ;;  %v745_v46 = vsel %vm652_vm3, %v1262_v42, 0.0  ;;  %v714_v54 = vmul.f32 %v1262_v42, %v1378_v3 }
 0x320   : > { %v801_v43 = vsel %vm652_vm3, %v715_v41, 0.0  ;;  %v850_v52 = vmul.f32 %v715_v41, %v1380_v4 }
 0x321   : > { %v1264_v44 = vpop.eup %1263  ;;  %802 = vadd.xlane.f32.xlu1 %v801_v43  ;;  %v798_v57 = vsel %vm652_vm3, %v714_v54, 0.0  ;;  %v849_v60 = vmul.f32 %v714_v54, %v1378_v3 }
 0x322   : > { %v742_v45 = vsel %vm652_vm3, %v1264_v44, 0.0  ;;  %v713_v47 = vmul.f32 %v1264_v44, %v1376_v2  ;;  %v858_v55 = vsel %vm652_vm3, %v850_v52, 0.0 }
 0x323   : > { %743 = vadd.xlane.f32.xlu0 %v742_v45  ;;  %v855_v62 = vsel %vm652_vm3, %v849_v60, 0.0 }
 0x324   : > { %v795_v51 = vsel %vm652_vm3, %v713_v47, 0.0  ;;  %v848_v56 = vmul.f32 %v713_v47, %v1376_v2  ;;  %v727_v2 = vpop.permute.xlu1 %726 }
 0x325   : > { %v1266_v48 = vpop.eup %1265  ;;  %746 = vadd.xlane.f32.xlu1 %v745_v46  ;;  %v738_v13 = vmul.f32 %v1522_v19, %v727_v2 }
 0x326   : > { %v751_v49 = vsel %vm652_vm3, %v1266_v48, 0.0  ;;  %v716_v50 = vmul.f32 %v1266_v48, %v1384_v6  ;;  %v852_v59 = vsel %vm652_vm3, %v848_v56, 0.0  ;;  %v1268_v15 = vpop.eup %1267 }
 0x327   : > { %752 = vadd.xlane.f32.xlu0 %v751_v49 }
 0x328   : > { %v804_v53 = vsel %vm652_vm3, %v716_v50, 0.0  ;;  %v851_v58 = vmul.f32 %v716_v50, %v1384_v6  ;;  %v731_v6 = vpop.permute.xlu1 %730 }
 0x329   : > { %796 = vadd.xlane.f32.xlu1 %v795_v51  ;;  %v740_v8 = vmul.f32 %v1533_v24, %v731_v6 }
 0x32a   : > { %v861_v4 = vsel %vm652_vm3, %v851_v58, 0.0 }
 0x32b   : > { %805 = vadd.xlane.f32.xlu0 %v804_v53 }
 0x32c   : > { %v733_v63 = vpop.permute.xlu1 %732 }
 0x32d   : > { %859 = vadd.xlane.f32.xlu1 %v858_v55  ;;  %v741_v18 = vmul.f32 %v1268_v15, %v733_v63 }
 0x32f   : > { %799 = vadd.xlane.f32.xlu0 %v798_v57 }
 0x330   : > { %v782_v0 = vpop.permute.xlu1 %781 }
 0x331   : > { %853 = vadd.xlane.f32.xlu1 %v852_v59  ;;  %v792_v36 = vmul.f32 %v1527_v21, %v782_v0 }
 0x333   : > { %862 = vadd.xlane.f32.xlu0 %v861_v4 }
 0x334   : > { %v786_v7 = vpop.permute.xlu1 %785 }
 0x335   : > { %v794_v32 = vmul.f32 %v1268_v15, %v786_v7 }
 0x337   : > { %856 = vadd.xlane.f32.xlu0 %v855_v62 }
 0x338   : > { %v835_v3 = vpop.permute.xlu1 %834 }
 0x339   : > { %v845_v39 = vmul.f32 %v1527_v21, %v835_v3 }
 0x342   : > { %838 = vrot.lane.b32.xlu1 %v1512_v11, %s1314_s25 }
 0x34d   : > { %836 = vrot.lane.b32.xlu0 %v1504_v61, %s1314_s25 }
 0x3ac   : > { %v750_v9 = vpop.xlane.xlu0 %749 }
 0x3ad   : > { %v756_v10 = vadd.f32 %v750_v9, %v740_v8 }
 0x3ae   : > { %v803_v12 = vpop.xlane.xlu1 %802 }
 0x3af   : > { %766 = vrot.lane.b32.xlu0 %v756_v10, %s1315_s26  ;;  %v809_v16 = vadd.f32 %v803_v12, %v1536_v25  ;;  %v844_v25 = vmul.f32 %v1522_v19, %v1546_v26 }
 0x3b0   : > { %v744_v61 = vpop.xlane.xlu0 %743 }
 0x3b1   : > { %v754_v14 = vadd.f32 %v744_v61, %v738_v13 }
 0x3b2   : > { %v747_v17 = vpop.xlane.xlu1 %746 }
 0x3b3   : > { %762 = vrot.lane.b32.xlu0 %v754_v14, %s1315_s26  ;;  %v755_v29 = vadd.f32 %v747_v17, %v1531_v22 }
 0x3b4   : > { %v753_v11 = vpop.xlane.xlu0 %752 }
 0x3b5   : > { %v757_v23 = vadd.f32 %v753_v11, %v741_v18 }
 0x3b6   : > { %v797_v27 = vpop.xlane.xlu1 %796 }
 0x3b7   : > { %819 = vrot.lane.b32.xlu0 %v809_v16, %s1316_s27  ;;  %768 = vrot.lane.b32.xlu1 %v757_v23, %s1315_s26  ;;  %v807_v30 = vadd.f32 %v797_v27, %v1525_v20 }
 0x3b8   : > { %v806_v28 = vpop.xlane.xlu0 %805 }
 0x3b9   : > { %v810_v34 = vadd.f32 %v806_v28, %v794_v32 }
 0x3ba   : > { %v860_v31 = vpop.xlane.xlu1 %859 }
 0x3bb   : > { %815 = vrot.lane.b32.xlu0 %v807_v30, %s1316_s27  ;;  %764 = vrot.lane.b32.xlu1 %v755_v29, %s1315_s26 }
 0x3bc   : > { %v800_v33 = vpop.xlane.xlu0 %799 }
 0x3bd   : > { %v808_v38 = vadd.f32 %v800_v33, %v792_v36 }
 0x3be   : > { %v854_v35 = vpop.xlane.xlu1 %853 }
 0x3bf   : > { %v864_v37 = vadd.f32 %v854_v35, %v844_v25  ;;  %821 = vrot.lane.b32.xlu1 %v810_v34, %s1316_s27 }
 0x3c0   : > { %v863_v22 = vpop.xlane.xlu0 %862 }
 0x3c1   : > { %872 = vrot.lane.b32.xlu0 %v864_v37, %s1317_s28 }
 0x3c2   : > { %v839_v20 = vpop.permute.xlu1 %838 }
 0x3c3   : > { %817 = vrot.lane.b32.xlu1 %v808_v38, %s1316_s27  ;;  %v847_v41 = vmul.f32 %v1268_v15, %v839_v20 }
 0x3c4   : > { %v857_v40 = vpop.xlane.xlu0 %856 }
 0x3c5   : > { %v865_v42 = vadd.f32 %v857_v40, %v845_v39  ;;  %v867_v26 = vadd.f32 %v863_v22, %v847_v41 }
 0x3c7   : > { %874 = vrot.lane.b32.xlu1 %v865_v42, %s1317_s28 }
 0x3c8   : > { %v837_v19 = vpop.permute.xlu0 %836 }
 0x3c9   : > { %v846_v43 = vmul.f32 %v1533_v24, %v837_v19 }
 0x3cb   : > { %v866_v44 = vadd.f32 %v860_v31, %v846_v43  ;;  %878 = vrot.lane.b32.xlu1 %v867_v26, %s1317_s28 }
 0x3cd   : > { %876 = vrot.lane.b32.xlu0 %v866_v44, %s1317_s28 }
 0x421   : > { %v767_v45 = vpop.permute.xlu0 %766 }
 0x422   : > { %777 = vst.msk [vmem:[#allocation2 + $0x10] sm:$0xff] %vm774_vm4, %v767_v45 }
 0x425   : > { %v763_v46 = vpop.permute.xlu0 %762 }
 0x426   : > { %775 = vst.msk [vmem:[#allocation2] sm:$0xff] %vm774_vm4, %v763_v46 }
 0x429   : > { %v769_v21 = vpop.permute.xlu1 %768  ;;  %v820_v47 = vpop.permute.xlu0 %819 }
 0x42a   : > { %778 = vst.msk [vmem:[#allocation2 + $0x18] sm:$0xff] %vm774_vm4, %v769_v21 }
 0x42b   : > { %830 = vst.msk [vmem:[#allocation2 + $0x10] sm:$0xff] %vm827_vm5, %v820_v47 }
 0x42d   : > { %v765_v48 = vpop.permute.xlu1 %764  ;;  %v816_v49 = vpop.permute.xlu0 %815 }
 0x42e   : > { %776 = vst.msk [vmem:[#allocation2 + $0x8] sm:$0xff] %vm774_vm4, %v765_v48 }
 0x42f   : > { %828 = vst.msk [vmem:[#allocation2] sm:$0xff] %vm827_vm5, %v816_v49 }
 0x431   : > { %v822_v50 = vpop.permute.xlu1 %821 }
 0x432   : > { %831 = vst.msk [vmem:[#allocation2 + $0x18] sm:$0xff] %vm827_vm5, %v822_v50 }
 0x433   : > { %v873_v24 = vpop.permute.xlu0 %872 }
 0x434   : > { %885 = vst.msk [vmem:[#allocation2] sm:$0xff] %vm884_vm6, %v873_v24 }
 0x435   : > { %v818_v51 = vpop.permute.xlu1 %817 }
 0x436   : > { %829 = vst.msk [vmem:[#allocation2 + $0x8] sm:$0xff] %vm827_vm5, %v818_v51 }
 0x439   : > { %v875_v52 = vpop.permute.xlu1 %874 }
 0x43a   : > { %886 = vst.msk [vmem:[#allocation2 + $0x8] sm:$0xff] %vm884_vm6, %v875_v52 }
 0x43b   : > { %v892_v53 = vld [vmem:[#allocation2] sm:$0xff] }
 0x43c   : > { %1269 = vrcp.f32 %v892_v53 }
 0x43d   : > { %v879_v54 = vpop.permute.xlu1 %878 }
 0x43e   : > { %888 = vst.msk [vmem:[#allocation2 + $0x18] sm:$0xff] %vm884_vm6, %v879_v54 }
 0x43f   : > { %v877_v55 = vpop.permute.xlu0 %876 }
 0x440   : > { %887 = vst.msk [vmem:[#allocation2 + $0x10] sm:$0xff] %vm884_vm6, %v877_v55 }
 0x441   : > { %v893_v56 = vld [vmem:[#allocation2 + $0x8] sm:$0xff] }
 0x442   : > { %1271 = vrcp.f32 %v893_v56 }
 0x445   : > { %v895_v57 = vld [vmem:[#allocation2 + $0x18] sm:$0xff] }
 0x446   : > { %v1270_v58 = vpop.eup %1269  ;;  %1273 = vrcp.f32 %v895_v57 }
 0x447   : > { %904 = vrot.lane.b32.xlu0 %v1270_v58, %s1315_s26  ;;  %v894_v59 = vld [vmem:[#allocation2 + $0x10] sm:$0xff] }
 0x448   : > { %1275 = vrcp.f32 %v894_v59 }
 0x44c   : > { %v1272_v4 = vpop.eup %1271 }
 0x44d   : > { %906 = vrot.lane.b32.xlu1 %v1272_v4, %s1315_s26 }
 0x450   : > { %v1274_v60 = vpop.eup %1273 }
 0x451   : > { %910 = vrot.lane.b32.xlu1 %v1274_v60, %s1315_s26 }
 0x452   : > { %v1276_v62 = vpop.eup %1275 }
 0x453   : > { %908 = vrot.lane.b32.xlu0 %v1276_v62, %s1315_s26 }
 0x455   : > { %926 = vrot.lane.b32.xlu1 %v1274_v60, %s1316_s27 }
 0x457   : > { %920 = vrot.lane.b32.xlu0 %v1270_v58, %s1316_s27 }
 0x459   : > { %922 = vrot.lane.b32.xlu1 %v1272_v4, %s1316_s27 }
 0x45b   : > { %924 = vrot.lane.b32.xlu0 %v1276_v62, %s1316_s27 }
 0x4b9   : > { %v905_v2 = vpop.permute.xlu0 %904 }
 0x4ba   : > { %v916_v6 = vmul.f32 %v905_v2, %v892_v53 }
 0x4bc   : > { %v936_v63 = vmul.f32 %v916_v6, %v916_v6 }
 0x4be   : > { %944 = vrot.lane.b32.xlu0 %v936_v63, %s1315_s26 }
 0x4bf   : > { %v907_v0 = vpop.permute.xlu1 %906 }
 0x4c0   : > { %v917_v1 = vmul.f32 %v907_v0, %v893_v56 }
 0x4c2   : > { %v937_v5 = vmul.f32 %v917_v1, %v917_v1 }
 0x4c3   : > { %v911_v7 = vpop.permute.xlu1 %910 }
 0x4c4   : > { %v919_v3 = vmul.f32 %v911_v7, %v895_v57  ;;  %946 = vrot.lane.b32.xlu1 %v937_v5, %s1315_s26 }
 0x4c5   : > { %v909_v8 = vpop.permute.xlu0 %908 }
 0x4c6   : > { %v939_v9 = vmul.f32 %v919_v3, %v919_v3  ;;  %v918_v10 = vmul.f32 %v909_v8, %v894_v59 }
 0x4c7   : > { %v927_v61 = vpop.permute.xlu1 %926 }
 0x4c8   : > { %v938_v12 = vmul.f32 %v918_v10, %v918_v10  ;;  %950 = vrot.lane.b32.xlu1 %v939_v9, %s1315_s26  ;;  %v935_v29 = vmul.f32 %v927_v61, %v895_v57 }
 0x4c9   : > { %v921_v13 = vpop.permute.xlu0 %920 }
 0x4ca   : > { %948 = vrot.lane.b32.xlu0 %v938_v12, %s1315_s26  ;;  %v932_v15 = vmul.f32 %v921_v13, %v892_v53 }
 0x4cb   : > { %v923_v11 = vpop.permute.xlu1 %922 }
 0x4cc   : > { %998 = vrot.lane.b32.xlu1 %v917_v1, %s1313_s24  ;;  %v933_v23 = vmul.f32 %v923_v11, %v893_v56 }
 0x4cd   : > { %v925_v14 = vpop.permute.xlu0 %924 }
 0x4ce   : > { %996 = vrot.lane.b32.xlu0 %v916_v6, %s1313_s24  ;;  %v934_v32 = vmul.f32 %v925_v14, %v894_v59 }
 0x4d0   : > { %1002 = vrot.lane.b32.xlu1 %v919_v3, %s1313_s24 }
 0x4d2   : > { %1000 = vrot.lane.b32.xlu0 %v918_v10, %s1313_s24 }
 0x530   : > { %v945_v17 = vpop.permute.xlu0 %944 }
 0x531   : > { %v956_v18 = vsub.f32 %v932_v15, %v945_v17 }
 0x533   : > { %v960_v16 = vmax.f32 %v956_v18, 1e-09 }
 0x535   : > { %1277 = vrsqrt.f32 %v960_v16  ;;  %vm966_vm7 = vcmp.eq.f32.partialorder %v960_v16, inf  ;;  %v969_v39 = vand.u32 2147483648, %v960_v16  ;;  %vm968_vm8 = vcmp.eq.f32.partialorder %v960_v16, 0.0 }
 0x536   : > { %v947_v27 = vpop.permute.xlu1 %946 }
 0x537   : > { %v957_v28 = vsub.f32 %v933_v23, %v947_v27 }
 0x539   : > { %v961_v30 = vmax.f32 %v957_v28, 1e-09 }
 0x53a   : > { %v951_v31 = vpop.permute.xlu1 %950 }
 0x53b   : > { %1279 = vrsqrt.f32 %v961_v30  ;;  %v959_v33 = vsub.f32 %v935_v29, %v951_v31  ;;  %vm973_vm9 = vcmp.eq.f32.partialorder %v961_v30, inf  ;;  %v976_v44 = vand.u32 2147483648, %v961_v30 }
 0x53c   : > { %v949_v25 = vpop.permute.xlu0 %948  ;;  %vm975_vm10 = vcmp.eq.f32.partialorder %v961_v30, 0.0 }
 0x53d   : > { %v963_v34 = vmax.f32 %v959_v33, 1e-09  ;;  %v958_v35 = vsub.f32 %v934_v32, %v949_v25 }
 0x53e   : > { %v999_v36 = vpop.permute.xlu1 %998 }
 0x53f   : > { %v1278_v37 = vpop.eup %1277  ;;  %1281 = vrsqrt.f32 %v963_v34  ;;  %v962_v22 = vmax.f32 %v958_v35, 1e-09  ;;  %1009 = vst.msk [vmem:[%s1616_s7 + $0x8] sm:$0xff] %vm258_vm2, %v999_v36  ;;  %vm987_vm11 = vcmp.eq.f32.partialorder %v963_v34, inf  ;;  %v990_v49 = vand.u32 2147483648, %v963_v34 }
 0x540   : > { %v997_v38 = vpop.permute.xlu0 %996  ;;  %v965_v20 = vmul.f32 %v1278_v37, %v960_v16  ;;  %vm989_vm12 = vcmp.eq.f32.partialorder %v963_v34, 0.0 }
 0x541   : > { %1283 = vrsqrt.f32 %v962_v22  ;;  %1008 = vst.msk [vmem:[%s1616_s7] sm:$0xff] %vm258_vm2, %v997_v38  ;;  %vm980_vm13 = vcmp.eq.f32.partialorder %v962_v22, inf  ;;  %v983_v52 = vand.u32 2147483648, %v962_v22  ;;  %vm982_vm14 = vcmp.eq.f32.partialorder %v962_v22, 0.0 }
 0x542   : > { %v1003_v40 = vpop.permute.xlu1 %1002  ;;  %v967_v41 = vsel %vm966_vm7, %v960_v16, %v965_v20 }
 0x543   : > { %1011 = vst.msk [vmem:[%s1616_s7 + $0x18] sm:$0xff] %vm258_vm2, %v1003_v40  ;;  %v970_v42 = vsel %vm968_vm8, %v969_v39, %v967_v41 }
 0x544   : > { %1016 = vrot.lane.b32.xlu0 %v970_v42, %s1314_s25  ;;  %v1001_v19 = vpop.permute.xlu0 %1000 }
 0x545   : > { %v1280_v26 = vpop.eup %1279  ;;  %1010 = vst.msk [vmem:[%s1616_s7 + $0x10] sm:$0xff] %vm258_vm2, %v1001_v19 }
 0x546   : > { %v972_v43 = vmul.f32 %v1280_v26, %v961_v30 }
 0x548   : > { %v974_v45 = vsel %vm973_vm9, %v961_v30, %v972_v43 }
 0x549   : > { %v1282_v46 = vpop.eup %1281  ;;  %v977_v21 = vsel %vm975_vm10, %v976_v44, %v974_v45 }
 0x54a   : > { %1018 = vrot.lane.b32.xlu1 %v977_v21, %s1314_s25  ;;  %v986_v47 = vmul.f32 %v1282_v46, %v963_v34 }
 0x54b   : > { %v1284_v48 = vpop.eup %1283 }
 0x54c   : > { %v988_v50 = vsel %vm987_vm11, %v963_v34, %v986_v47  ;;  %v979_v24 = vmul.f32 %v1284_v48, %v962_v22 }
 0x54d   : > { %v991_v51 = vsel %vm989_vm12, %v990_v49, %v988_v50 }
 0x54e   : > { %1022 = vrot.lane.b32.xlu1 %v991_v51, %s1314_s25  ;;  %v981_v53 = vsel %vm980_vm13, %v962_v22, %v979_v24 }
 0x54f   : > { %v984_v54 = vsel %vm982_vm14, %v983_v52, %v981_v53 }
 0x550   : > { %1020 = vrot.lane.b32.xlu0 %v984_v54, %s1314_s25 }
 0x5b6   : > { %v1017_v55 = vpop.permute.xlu0 %1016 }
 0x5b7   : > { %1028 = vst.msk [vmem:[%s1616_s7 + $0x20] sm:$0xff] %vm258_vm2, %v1017_v55 }
 0x5bc   : > { %v1019_v56 = vpop.permute.xlu1 %1018 }
 0x5bd   : > { %1029 = vst.msk [vmem:[%s1616_s7 + $0x28] sm:$0xff] %vm258_vm2, %v1019_v56 }
 0x5c0   : > { %v1023_v57 = vpop.permute.xlu1 %1022 }
 0x5c1   : > { %1031 = vst.msk [vmem:[%s1616_s7 + $0x38] sm:$0xff] %vm258_vm2, %v1023_v57 }
 0x5c2   : > { %v1021_v58 = vpop.permute.xlu0 %1020 }
 0x5c3   : > { %1030 = vst.msk [vmem:[%s1616_s7 + $0x30] sm:$0xff] %vm258_vm2, %v1021_v58 }
 0x5c4 PF: > { %s15_s20 = sadd.s32 1, %s1307_s20   ;;  %s1653_s18 = smov %s1303_s19 }
 0x5c5   : > { %p12_p5 = scmp.ge.s32.totalorder %s15_s20, 4   ;;  %s1654_s19 = smov %s1656_s21 }
 0x5c7   :  { %14 = sbr.rel (!%p12_p5) target bundleno = 2 (0x2), region = 78 }

</bundles_post_ra>
